<compile_context>
chip_gen: v6e
topology: v6e:2x2x1
jax: 0.10.0
libtpu: 0.0.40
codegen_flags: <defaults>
</compile_context>

<pallas_src>
import math

import jax
import jax.numpy as jnp
from jax.experimental import pallas as pl
from jax.experimental.pallas import tpu as pltpu


# -----------------------------------------------------------------------------
# Config (small, synthetic, consistent with the MistralConfig fields used)
# -----------------------------------------------------------------------------
HIDDEN_SIZE = 32
NUM_HEADS = 4
NUM_KV_HEADS = 2
HEAD_DIM = HIDDEN_SIZE // NUM_HEADS          # 8
NUM_KV_GROUPS = NUM_HEADS // NUM_KV_HEADS    # 2
ROPE_THETA = 10000.0
BATCH = 2
SEQ = 8

# TODO(synk): kv_bit < 16 pseudo-quantization, KV cache (past_key_value),
# sliding-window cache slicing and the padding-mask varlen path are not
# modeled (eval mode, no cache, full causal attention, dropout = 0).


# -----------------------------------------------------------------------------
# Fused forward kernel: one grid step per batch element.
# -----------------------------------------------------------------------------
def _fused_attn_kernel(x_ref, wqkv_ref, wo_ref, cos_ref, sin_ref, o_ref):
    x = x_ref[0]             # (S, H)
    wqkv = wqkv_ref[...]     # (NH*D + 2*NKV*D, H)   PyTorch (out, in) layout
    wo = wo_ref[...]         # (H, NH*D)             PyTorch (out, in) layout
    cos = cos_ref[0]         # (S, D)
    sin = sin_ref[0]         # (S, D)

    S = x.shape[0]
    D = HEAD_DIM
    Q_OUT = NUM_HEADS * D
    KV_OUT = NUM_KV_HEADS * D

    # Fused q/k/v projection: x @ wqkv.T without materializing a transpose.
    qkv = jax.lax.dot_general(
        x, wqkv, (((1,), (1,)), ((), ())),
        preferred_element_type=jnp.float32)          # (S, Q_OUT + 2*KV_OUT)

    # Causal mask (dtype-aware large negative).
    row = jax.lax.broadcasted_iota(jnp.int32, (S, S), 0)
    col = jax.lax.broadcasted_iota(jnp.int32, (S, S), 1)
    causal = col <= row
    neg = jnp.finfo(jnp.float32).min / 2.0

    def rope(t):                                     # (S, D) -> (S, D)
        t1 = t[:, : D // 2]
        t2 = t[:, D // 2:]
        return t * cos + jnp.concatenate([-t2, t1], axis=-1) * sin

    # K/V per KV head; RoPE on K computed once and shared across its group.
    k_heads = []
    v_heads = []
    for g in range(NUM_KV_HEADS):
        k_g = qkv[:, Q_OUT + g * D: Q_OUT + (g + 1) * D]
        v_g = qkv[:, Q_OUT + KV_OUT + g * D: Q_OUT + KV_OUT + (g + 1) * D]
        k_heads.append(rope(k_g))
        v_heads.append(v_g)

    scale = 1.0 / math.sqrt(D)
    head_outs = []
    for h in range(NUM_HEADS):
        g = h // NUM_KV_GROUPS                       # GQA head -> kv head
        q_h = rope(qkv[:, h * D: (h + 1) * D]) * scale   # fold 1/sqrt(D) into q
        s = jax.lax.dot_general(                     # (S, S) = q @ k.T
            q_h, k_heads[g], (((1,), (1,)), ((), ())),
            preferred_element_type=jnp.float32)
        s = jnp.where(causal, s, neg)
        m = jnp.max(s, axis=-1, keepdims=True)
        p = jnp.exp(s - m)                           # softmax kept in f32
        l = jnp.sum(p, axis=-1, keepdims=True)
        o = jnp.dot(p, v_heads[g], preferred_element_type=jnp.float32)  # (S, D)
        # Deferred normalization: O(S*D) multiply, reciprocal on the EUP.
        head_outs.append(o * pl.reciprocal(l, approx=True))

    attn = jnp.concatenate(head_outs, axis=-1)       # (S, NH*D), lane-dense

    out = jax.lax.dot_general(                       # (S, H) = attn @ wo.T
        attn, wo, (((1,), (1,)), ((), ())),
        preferred_element_type=jnp.float32)
    o_ref[0] = out.astype(o_ref.dtype)


# -----------------------------------------------------------------------------
# Wrapper: rotary tables from position_ids (jit-safe), fused-weight concat.
# -----------------------------------------------------------------------------
def rope_cos_sin(position_ids, dim, base):
    # Equivalent to indexing the HF cos/sin cache with position_ids, but
    # computed directly from the (traced) ids -> no concretization of a
    # traced max(), no host sync.
    inv_freq = 1.0 / (base ** (jnp.arange(0, dim, 2, dtype=jnp.float32) / dim))
    freqs = position_ids.astype(jnp.float32)[..., None] * inv_freq   # (B,S,D/2)
    emb = jnp.concatenate([freqs, freqs], axis=-1)                   # (B,S,D)
    return jnp.cos(emb), jnp.sin(emb)


def mistral_flash_attention2_forward(hidden_states, position_ids, params):
    B, S, H = hidden_states.shape
    cos, sin = rope_cos_sin(position_ids, HEAD_DIM, ROPE_THETA)      # (B,S,D)

    # Fuse the three projection weights into one RHS (kept in PyTorch
    # (out, in) convention; contraction happens on the last dim in-kernel).
    wqkv = jnp.concatenate(
        [params["q_proj"], params["k_proj"], params["v_proj"]], axis=0)
    wo = params["o_proj"]

    return pl.pallas_call(
        _fused_attn_kernel,
        out_shape=jax.ShapeDtypeStruct((B, S, H), hidden_states.dtype),
        grid=(B,),
        in_specs=[
            pl.BlockSpec((1, S, H), lambda b: (b, 0, 0)),
            pl.BlockSpec(wqkv.shape, lambda b: (0, 0)),
            pl.BlockSpec(wo.shape, lambda b: (0, 0)),
            pl.BlockSpec((1, S, HEAD_DIM), lambda b: (b, 0, 0)),
            pl.BlockSpec((1, S, HEAD_DIM), lambda b: (b, 0, 0)),
        ],
        out_specs=pl.BlockSpec((1, S, H), lambda b: (b, 0, 0)),
        compiler_params=pltpu.CompilerParams(
            dimension_semantics=("parallel",)),      # v7x: one batch per TC
    )(hidden_states, wqkv, wo, cos, sin)


# -----------------------------------------------------------------------------
# Pure-JAX reference (mirrors the PyTorch module, eval mode, no cache)
# -----------------------------------------------------------------------------
def _ref_forward(hidden_states, position_ids, params):
    B, S, H = hidden_states.shape
    x = hidden_states.reshape(B * S, H)
    q = x @ params["q_proj"].T
    k = x @ params["k_proj"].T
    v = x @ params["v_proj"].T
    q = q.reshape(B, S, NUM_HEADS, HEAD_DIM).transpose(0, 2, 1, 3)
    k = k.reshape(B, S, NUM_KV_HEADS, HEAD_DIM).transpose(0, 2, 1, 3)
    v = v.reshape(B, S, NUM_KV_HEADS, HEAD_DIM).transpose(0, 2, 1, 3)

    cos, sin = rope_cos_sin(position_ids, HEAD_DIM, ROPE_THETA)
    cos_, sin_ = cos[:, None], sin[:, None]

    def rot(t):
        t1, t2 = t[..., : HEAD_DIM // 2], t[..., HEAD_DIM // 2:]
        return jnp.concatenate([-t2, t1], axis=-1)

    q = q * cos_ + rot(q) * sin_
    k = k * cos_ + rot(k) * sin_
    k = jnp.repeat(k, NUM_KV_GROUPS, axis=1)
    v = jnp.repeat(v, NUM_KV_GROUPS, axis=1)

    s = jnp.einsum("bhqd,bhkd->bhqk", q, k) / math.sqrt(HEAD_DIM)
    mask = jnp.tril(jnp.ones((S, S), dtype=bool))
    s = jnp.where(mask, s, -jnp.inf)
    p = jax.nn.softmax(s, axis=-1)
    o = jnp.einsum("bhqk,bhkd->bhqd", p, v)
    o = o.transpose(0, 2, 1, 3).reshape(B * S, H)
    return (o @ params["o_proj"].T).reshape(B, S, H)


# -----------------------------------------------------------------------------
# Deterministic parameter init + run
# -----------------------------------------------------------------------------
def init_params(key):
    k0, k1, k2, k3 = jax.random.split(key, 4)
    s = 0.05
    return {
        # PyTorch nn.Linear weight convention: (out_features, in_features)
        "q_proj": s * jax.random.normal(k0, (NUM_HEADS * HEAD_DIM, HIDDEN_SIZE), jnp.float32),
        "k_proj": s * jax.random.normal(k1, (NUM_KV_HEADS * HEAD_DIM, HIDDEN_SIZE), jnp.float32),
        "v_proj": s * jax.random.normal(k2, (NUM_KV_HEADS * HEAD_DIM, HIDDEN_SIZE), jnp.float32),
        "o_proj": s * jax.random.normal(k3, (HIDDEN_SIZE, NUM_HEADS * HEAD_DIM), jnp.float32),
    }


if __name__ == "__main__":
    key = jax.random.PRNGKey(0)
    pkey, xkey = jax.random.split(key)
    params = init_params(pkey)

    hidden_states = jax.random.normal(xkey, (BATCH, SEQ, HIDDEN_SIZE), jnp.float32)
    position_ids = jnp.broadcast_to(
        jnp.arange(SEQ, dtype=jnp.int32)[None, :], (BATCH, SEQ))

    fwd = jax.jit(mistral_flash_attention2_forward)
    out = jax.block_until_ready(fwd(hidden_states, position_ids, params))

    assert out.shape == (BATCH, SEQ, HIDDEN_SIZE)
    assert bool(jnp.all(jnp.isfinite(out)))

    ref = _ref_forward(hidden_states, position_ids, params)
    max_err = float(jnp.max(jnp.abs(out - ref)))
    assert max_err < 1e-2, f"mismatch vs reference: max abs err = {max_err}"

    print("KERNEL_OK")
</pallas_src>

<mosaic_0001>
module attributes {stable_mosaic.version = 11 : i64} {
  func.func @_fused_attn_kernel(%arg0: i32, %arg1: memref<1x8x32xf32, #tpu.memory_space<vmem>>, %arg2: memref<64x32xf32, #tpu.memory_space<vmem>>, %arg3: memref<32x32xf32, #tpu.memory_space<vmem>>, %arg4: memref<1x8x8xf32, #tpu.memory_space<vmem>>, %arg5: memref<1x8x8xf32, #tpu.memory_space<vmem>>, %arg6: memref<1x8x32xf32, #tpu.memory_space<vmem>>) attributes {dimension_semantics = [#tpu.dimension_semantics<parallel>], iteration_bounds = array<i64: 2>, scalar_prefetch = 0 : i64, scratch_operands = 0 : i64, tpu.core_type = #tpu.core_type<tc>, window_params = [{transform_indices = @transform_0, window_bounds = array<i64: 1, 8, 32>}, {pipeline_mode = #tpu.pipeline_mode<synchronous>, transform_indices = @transform_1, window_bounds = array<i64: 64, 32>}, {pipeline_mode = #tpu.pipeline_mode<synchronous>, transform_indices = @transform_2, window_bounds = array<i64: 32, 32>}, {transform_indices = @transform_3, window_bounds = array<i64: 1, 8, 8>}, {transform_indices = @transform_4, window_bounds = array<i64: 1, 8, 8>}, {transform_indices = @transform_5, window_bounds = array<i64: 1, 8, 32>}]} {
    %c0 = arith.constant 0 : index
    %c0_0 = arith.constant 0 : index
    %c0_1 = arith.constant 0 : index
    %0 = vector.load %arg1[%c0, %c0_0, %c0_1] : memref<1x8x32xf32, #tpu.memory_space<vmem>>, vector<1x8x32xf32>
    %1 = vector.shape_cast %0 : vector<1x8x32xf32> to vector<8x32xf32>
    %c0_2 = arith.constant 0 : index
    %c0_3 = arith.constant 0 : index
    %2 = vector.load %arg2[%c0_2, %c0_3] : memref<64x32xf32, #tpu.memory_space<vmem>>, vector<64x32xf32>
    %c0_4 = arith.constant 0 : index
    %c0_5 = arith.constant 0 : index
    %3 = vector.load %arg3[%c0_4, %c0_5] : memref<32x32xf32, #tpu.memory_space<vmem>>, vector<32x32xf32>
    %c0_6 = arith.constant 0 : index
    %c0_7 = arith.constant 0 : index
    %c0_8 = arith.constant 0 : index
    %4 = vector.load %arg4[%c0_6, %c0_7, %c0_8] : memref<1x8x8xf32, #tpu.memory_space<vmem>>, vector<1x8x8xf32>
    %5 = vector.shape_cast %4 : vector<1x8x8xf32> to vector<8x8xf32>
    %c0_9 = arith.constant 0 : index
    %c0_10 = arith.constant 0 : index
    %c0_11 = arith.constant 0 : index
    %6 = vector.load %arg5[%c0_9, %c0_10, %c0_11] : memref<1x8x8xf32, #tpu.memory_space<vmem>>, vector<1x8x8xf32>
    %7 = vector.shape_cast %6 : vector<1x8x8xf32> to vector<8x8xf32>
    %cst = arith.constant dense<0.000000e+00> : vector<8x64xf32>
    %8 = tpu.matmul %1, %2, %cst {dimension_numbers = #tpu.dot_dimension_numbers<[1], [1], [0], [0], [0, 0, 1, 0], [], []>} : vector<8x32xf32>, vector<64x32xf32>, vector<8x64xf32> -> vector<8x64xf32>
    %9 = tpu.iota {dimensions = array<i32: 0>} : vector<8x8xi32>
    %10 = tpu.iota {dimensions = array<i32: 1>} : vector<8x8xi32>
    %11 = arith.cmpi sle, %10, %9 : vector<8x8xi32>
    %12 = vector.extract_strided_slice %8 {offsets = [0, 32], sizes = [8, 8], strides = [1, 1]} : vector<8x64xf32> to vector<8x8xf32>
    %13 = vector.extract_strided_slice %8 {offsets = [0, 48], sizes = [8, 8], strides = [1, 1]} : vector<8x64xf32> to vector<8x8xf32>
    %14 = vector.extract_strided_slice %12 {offsets = [0, 0], sizes = [8, 4], strides = [1, 1]} : vector<8x8xf32> to vector<8x4xf32>
    %15 = vector.extract_strided_slice %12 {offsets = [0, 4], sizes = [8, 4], strides = [1, 1]} : vector<8x8xf32> to vector<8x4xf32>
    %16 = arith.mulf %12, %5 : vector<8x8xf32>
    %cst_12 = arith.constant 0.000000e+00 : f32
    %17 = vector.broadcast %cst_12 : f32 to vector<8x4xf32>
    %18 = arith.subf %17, %15 : vector<8x4xf32>
    %19 = tpu.concatenate %18, %14 in 1 : vector<8x4xf32>, vector<8x4xf32> -> vector<8x8xf32>
    %20 = arith.mulf %19, %7 : vector<8x8xf32>
    %21 = arith.addf %16, %20 : vector<8x8xf32>
    %22 = vector.extract_strided_slice %8 {offsets = [0, 40], sizes = [8, 8], strides = [1, 1]} : vector<8x64xf32> to vector<8x8xf32>
    %23 = vector.extract_strided_slice %8 {offsets = [0, 56], sizes = [8, 8], strides = [1, 1]} : vector<8x64xf32> to vector<8x8xf32>
    %24 = vector.extract_strided_slice %22 {offsets = [0, 0], sizes = [8, 4], strides = [1, 1]} : vector<8x8xf32> to vector<8x4xf32>
    %25 = vector.extract_strided_slice %22 {offsets = [0, 4], sizes = [8, 4], strides = [1, 1]} : vector<8x8xf32> to vector<8x4xf32>
    %26 = arith.mulf %22, %5 : vector<8x8xf32>
    %cst_13 = arith.constant 0.000000e+00 : f32
    %27 = vector.broadcast %cst_13 : f32 to vector<8x4xf32>
    %28 = arith.subf %27, %25 : vector<8x4xf32>
    %29 = tpu.concatenate %28, %24 in 1 : vector<8x4xf32>, vector<8x4xf32> -> vector<8x8xf32>
    %30 = arith.mulf %29, %7 : vector<8x8xf32>
    %31 = arith.addf %26, %30 : vector<8x8xf32>
    %32 = vector.extract_strided_slice %8 {offsets = [0, 0], sizes = [8, 8], strides = [1, 1]} : vector<8x64xf32> to vector<8x8xf32>
    %33 = vector.extract_strided_slice %32 {offsets = [0, 0], sizes = [8, 4], strides = [1, 1]} : vector<8x8xf32> to vector<8x4xf32>
    %34 = vector.extract_strided_slice %32 {offsets = [0, 4], sizes = [8, 4], strides = [1, 1]} : vector<8x8xf32> to vector<8x4xf32>
    %35 = arith.mulf %32, %5 : vector<8x8xf32>
    %cst_14 = arith.constant 0.000000e+00 : f32
    %36 = vector.broadcast %cst_14 : f32 to vector<8x4xf32>
    %37 = arith.subf %36, %34 : vector<8x4xf32>
    %38 = tpu.concatenate %37, %33 in 1 : vector<8x4xf32>, vector<8x4xf32> -> vector<8x8xf32>
    %39 = arith.mulf %38, %7 : vector<8x8xf32>
    %40 = arith.addf %35, %39 : vector<8x8xf32>
    %cst_15 = arith.constant 0.353553385 : f32
    %41 = vector.broadcast %cst_15 : f32 to vector<8x8xf32>
    %42 = arith.mulf %40, %41 : vector<8x8xf32>
    %cst_16 = arith.constant dense<0.000000e+00> : vector<8x8xf32>
    %43 = tpu.matmul %42, %21, %cst_16 {dimension_numbers = #tpu.dot_dimension_numbers<[1], [1], [0], [0], [0, 0, 1, 0], [], []>} : vector<8x8xf32>, vector<8x8xf32>, vector<8x8xf32> -> vector<8x8xf32>
    %cst_17 = arith.constant -1.70141173E+38 : f32
    %44 = vector.broadcast %cst_17 : f32 to vector<8x8xf32>
    %45 = arith.select %11, %43, %44 : vector<8x8xi1>, vector<8x8xf32>
    %cst_18 = arith.constant dense<0xFF800000> : vector<8xf32>
    %46 = vector.multi_reduction <maximumf>, %45, %cst_18 [1] : vector<8x8xf32> to vector<8xf32>
    %47 = vector.shape_cast %46 : vector<8xf32> to vector<8x1xf32>
    %48 = vector.broadcast %47 : vector<8x1xf32> to vector<8x8xf32>
    %49 = arith.subf %45, %48 : vector<8x8xf32>
    %50 = math.exp %49 : vector<8x8xf32>
    %cst_19 = arith.constant dense<0.000000e+00> : vector<8xf32>
    %51 = vector.multi_reduction <add>, %50, %cst_19 [1] : vector<8x8xf32> to vector<8xf32>
    %52 = vector.shape_cast %51 : vector<8xf32> to vector<8x1xf32>
    %cst_20 = arith.constant dense<0.000000e+00> : vector<8x8xf32>
    %53 = tpu.matmul %50, %13, %cst_20 {dimension_numbers = #tpu.dot_dimension_numbers<[1], [0], [0], [1], [0, 0, 1, 1], [], []>} : vector<8x8xf32>, vector<8x8xf32>, vector<8x8xf32> -> vector<8x8xf32>
    %54 = tpu.reciprocal %52 {approx = true} : vector<8x1xf32> -> vector<8x1xf32>
    %55 = vector.broadcast %54 : vector<8x1xf32> to vector<8x8xf32>
    %56 = arith.mulf %53, %55 : vector<8x8xf32>
    %57 = vector.extract_strided_slice %8 {offsets = [0, 8], sizes = [8, 8], strides = [1, 1]} : vector<8x64xf32> to vector<8x8xf32>
    %58 = vector.extract_strided_slice %57 {offsets = [0, 0], sizes = [8, 4], strides = [1, 1]} : vector<8x8xf32> to vector<8x4xf32>
    %59 = vector.extract_strided_slice %57 {offsets = [0, 4], sizes = [8, 4], strides = [1, 1]} : vector<8x8xf32> to vector<8x4xf32>
    %60 = arith.mulf %57, %5 : vector<8x8xf32>
    %cst_21 = arith.constant 0.000000e+00 : f32
    %61 = vector.broadcast %cst_21 : f32 to vector<8x4xf32>
    %62 = arith.subf %61, %59 : vector<8x4xf32>
    %63 = tpu.concatenate %62, %58 in 1 : vector<8x4xf32>, vector<8x4xf32> -> vector<8x8xf32>
    %64 = arith.mulf %63, %7 : vector<8x8xf32>
    %65 = arith.addf %60, %64 : vector<8x8xf32>
    %cst_22 = arith.constant 0.353553385 : f32
    %66 = vector.broadcast %cst_22 : f32 to vector<8x8xf32>
    %67 = arith.mulf %65, %66 : vector<8x8xf32>
    %cst_23 = arith.constant dense<0.000000e+00> : vector<8x8xf32>
    %68 = tpu.matmul %67, %21, %cst_23 {dimension_numbers = #tpu.dot_dimension_numbers<[1], [1], [0], [0], [0, 0, 1, 0], [], []>} : vector<8x8xf32>, vector<8x8xf32>, vector<8x8xf32> -> vector<8x8xf32>
    %cst_24 = arith.constant -1.70141173E+38 : f32
    %69 = vector.broadcast %cst_24 : f32 to vector<8x8xf32>
    %70 = arith.select %11, %68, %69 : vector<8x8xi1>, vector<8x8xf32>
    %cst_25 = arith.constant dense<0xFF800000> : vector<8xf32>
    %71 = vector.multi_reduction <maximumf>, %70, %cst_25 [1] : vector<8x8xf32> to vector<8xf32>
    %72 = vector.shape_cast %71 : vector<8xf32> to vector<8x1xf32>
    %73 = vector.broadcast %72 : vector<8x1xf32> to vector<8x8xf32>
    %74 = arith.subf %70, %73 : vector<8x8xf32>
    %75 = math.exp %74 : vector<8x8xf32>
    %cst_26 = arith.constant dense<0.000000e+00> : vector<8xf32>
    %76 = vector.multi_reduction <add>, %75, %cst_26 [1] : vector<8x8xf32> to vector<8xf32>
    %77 = vector.shape_cast %76 : vector<8xf32> to vector<8x1xf32>
    %cst_27 = arith.constant dense<0.000000e+00> : vector<8x8xf32>
    %78 = tpu.matmul %75, %13, %cst_27 {dimension_numbers = #tpu.dot_dimension_numbers<[1], [0], [0], [1], [0, 0, 1, 1], [], []>} : vector<8x8xf32>, vector<8x8xf32>, vector<8x8xf32> -> vector<8x8xf32>
    %79 = tpu.reciprocal %77 {approx = true} : vector<8x1xf32> -> vector<8x1xf32>
    %80 = vector.broadcast %79 : vector<8x1xf32> to vector<8x8xf32>
    %81 = arith.mulf %78, %80 : vector<8x8xf32>
    %82 = vector.extract_strided_slice %8 {offsets = [0, 16], sizes = [8, 8], strides = [1, 1]} : vector<8x64xf32> to vector<8x8xf32>
    %83 = vector.extract_strided_slice %82 {offsets = [0, 0], sizes = [8, 4], strides = [1, 1]} : vector<8x8xf32> to vector<8x4xf32>
    %84 = vector.extract_strided_slice %82 {offsets = [0, 4], sizes = [8, 4], strides = [1, 1]} : vector<8x8xf32> to vector<8x4xf32>
    %85 = arith.mulf %82, %5 : vector<8x8xf32>
    %cst_28 = arith.constant 0.000000e+00 : f32
    %86 = vector.broadcast %cst_28 : f32 to vector<8x4xf32>
    %87 = arith.subf %86, %84 : vector<8x4xf32>
    %88 = tpu.concatenate %87, %83 in 1 : vector<8x4xf32>, vector<8x4xf32> -> vector<8x8xf32>
    %89 = arith.mulf %88, %7 : vector<8x8xf32>
    %90 = arith.addf %85, %89 : vector<8x8xf32>
    %cst_29 = arith.constant 0.353553385 : f32
    %91 = vector.broadcast %cst_29 : f32 to vector<8x8xf32>
    %92 = arith.mulf %90, %91 : vector<8x8xf32>
    %cst_30 = arith.constant dense<0.000000e+00> : vector<8x8xf32>
    %93 = tpu.matmul %92, %31, %cst_30 {dimension_numbers = #tpu.dot_dimension_numbers<[1], [1], [0], [0], [0, 0, 1, 0], [], []>} : vector<8x8xf32>, vector<8x8xf32>, vector<8x8xf32> -> vector<8x8xf32>
    %cst_31 = arith.constant -1.70141173E+38 : f32
    %94 = vector.broadcast %cst_31 : f32 to vector<8x8xf32>
    %95 = arith.select %11, %93, %94 : vector<8x8xi1>, vector<8x8xf32>
    %cst_32 = arith.constant dense<0xFF800000> : vector<8xf32>
    %96 = vector.multi_reduction <maximumf>, %95, %cst_32 [1] : vector<8x8xf32> to vector<8xf32>
    %97 = vector.shape_cast %96 : vector<8xf32> to vector<8x1xf32>
    %98 = vector.broadcast %97 : vector<8x1xf32> to vector<8x8xf32>
    %99 = arith.subf %95, %98 : vector<8x8xf32>
    %100 = math.exp %99 : vector<8x8xf32>
    %cst_33 = arith.constant dense<0.000000e+00> : vector<8xf32>
    %101 = vector.multi_reduction <add>, %100, %cst_33 [1] : vector<8x8xf32> to vector<8xf32>
    %102 = vector.shape_cast %101 : vector<8xf32> to vector<8x1xf32>
    %cst_34 = arith.constant dense<0.000000e+00> : vector<8x8xf32>
    %103 = tpu.matmul %100, %23, %cst_34 {dimension_numbers = #tpu.dot_dimension_numbers<[1], [0], [0], [1], [0, 0, 1, 1], [], []>} : vector<8x8xf32>, vector<8x8xf32>, vector<8x8xf32> -> vector<8x8xf32>
    %104 = tpu.reciprocal %102 {approx = true} : vector<8x1xf32> -> vector<8x1xf32>
    %105 = vector.broadcast %104 : vector<8x1xf32> to vector<8x8xf32>
    %106 = arith.mulf %103, %105 : vector<8x8xf32>
    %107 = vector.extract_strided_slice %8 {offsets = [0, 24], sizes = [8, 8], strides = [1, 1]} : vector<8x64xf32> to vector<8x8xf32>
    %108 = vector.extract_strided_slice %107 {offsets = [0, 0], sizes = [8, 4], strides = [1, 1]} : vector<8x8xf32> to vector<8x4xf32>
    %109 = vector.extract_strided_slice %107 {offsets = [0, 4], sizes = [8, 4], strides = [1, 1]} : vector<8x8xf32> to vector<8x4xf32>
    %110 = arith.mulf %107, %5 : vector<8x8xf32>
    %cst_35 = arith.constant 0.000000e+00 : f32
    %111 = vector.broadcast %cst_35 : f32 to vector<8x4xf32>
    %112 = arith.subf %111, %109 : vector<8x4xf32>
    %113 = tpu.concatenate %112, %108 in 1 : vector<8x4xf32>, vector<8x4xf32> -> vector<8x8xf32>
    %114 = arith.mulf %113, %7 : vector<8x8xf32>
    %115 = arith.addf %110, %114 : vector<8x8xf32>
    %cst_36 = arith.constant 0.353553385 : f32
    %116 = vector.broadcast %cst_36 : f32 to vector<8x8xf32>
    %117 = arith.mulf %115, %116 : vector<8x8xf32>
    %cst_37 = arith.constant dense<0.000000e+00> : vector<8x8xf32>
    %118 = tpu.matmul %117, %31, %cst_37 {dimension_numbers = #tpu.dot_dimension_numbers<[1], [1], [0], [0], [0, 0, 1, 0], [], []>} : vector<8x8xf32>, vector<8x8xf32>, vector<8x8xf32> -> vector<8x8xf32>
    %cst_38 = arith.constant -1.70141173E+38 : f32
    %119 = vector.broadcast %cst_38 : f32 to vector<8x8xf32>
    %120 = arith.select %11, %118, %119 : vector<8x8xi1>, vector<8x8xf32>
    %cst_39 = arith.constant dense<0xFF800000> : vector<8xf32>
    %121 = vector.multi_reduction <maximumf>, %120, %cst_39 [1] : vector<8x8xf32> to vector<8xf32>
    %122 = vector.shape_cast %121 : vector<8xf32> to vector<8x1xf32>
    %123 = vector.broadcast %122 : vector<8x1xf32> to vector<8x8xf32>
    %124 = arith.subf %120, %123 : vector<8x8xf32>
    %125 = math.exp %124 : vector<8x8xf32>
    %cst_40 = arith.constant dense<0.000000e+00> : vector<8xf32>
    %126 = vector.multi_reduction <add>, %125, %cst_40 [1] : vector<8x8xf32> to vector<8xf32>
    %127 = vector.shape_cast %126 : vector<8xf32> to vector<8x1xf32>
    %cst_41 = arith.constant dense<0.000000e+00> : vector<8x8xf32>
    %128 = tpu.matmul %125, %23, %cst_41 {dimension_numbers = #tpu.dot_dimension_numbers<[1], [0], [0], [1], [0, 0, 1, 1], [], []>} : vector<8x8xf32>, vector<8x8xf32>, vector<8x8xf32> -> vector<8x8xf32>
    %129 = tpu.reciprocal %127 {approx = true} : vector<8x1xf32> -> vector<8x1xf32>
    %130 = vector.broadcast %129 : vector<8x1xf32> to vector<8x8xf32>
    %131 = arith.mulf %128, %130 : vector<8x8xf32>
    %132 = tpu.concatenate %56, %81, %106, %131 in 1 : vector<8x8xf32>, vector<8x8xf32>, vector<8x8xf32>, vector<8x8xf32> -> vector<8x32xf32>
    %cst_42 = arith.constant dense<0.000000e+00> : vector<8x32xf32>
    %133 = tpu.matmul %132, %3, %cst_42 {dimension_numbers = #tpu.dot_dimension_numbers<[1], [1], [0], [0], [0, 0, 1, 0], [], []>} : vector<8x32xf32>, vector<32x32xf32>, vector<8x32xf32> -> vector<8x32xf32>
    %c0_43 = arith.constant 0 : index
    %c0_44 = arith.constant 0 : index
    %c0_45 = arith.constant 0 : index
    %134 = vector.load %arg6[%c0_43, %c0_44, %c0_45] : memref<1x8x32xf32, #tpu.memory_space<vmem>>, vector<1x8x32xf32>
    %135 = vector.shape_cast %134 : vector<1x8x32xf32> to vector<8x32xf32>
    %136 = vector.shape_cast %133 : vector<8x32xf32> to vector<1x8x32xf32>
    tpu.vector_store %arg6[%c0_43, %c0_44, %c0_45], %136 {strides = array<i32>} : memref<1x8x32xf32, #tpu.memory_space<vmem>>, vector<1x8x32xf32>,
    return
  }
  func.func @transform_0(%arg0: i32) -> (i32, i32, i32) {
    %c0_i32 = arith.constant 0 : i32
    %c0_i32_0 = arith.constant 0 : i32
    %c0_i32_1 = arith.constant 0 : i32
    return %arg0, %c0_i32, %c0_i32_0 : i32, i32, i32
  }
  func.func @transform_1(%arg0: i32) -> (i32, i32) {
    %c0_i32 = arith.constant 0 : i32
    %c0_i32_0 = arith.constant 0 : i32
    %c0_i32_1 = arith.constant 0 : i32
    return %c0_i32, %c0_i32_0 : i32, i32
  }
  func.func @transform_2(%arg0: i32) -> (i32, i32) {
    %c0_i32 = arith.constant 0 : i32
    %c0_i32_0 = arith.constant 0 : i32
    %c0_i32_1 = arith.constant 0 : i32
    return %c0_i32, %c0_i32_0 : i32, i32
  }
  func.func @transform_3(%arg0: i32) -> (i32, i32, i32) {
    %c0_i32 = arith.constant 0 : i32
    %c0_i32_0 = arith.constant 0 : i32
    %c0_i32_1 = arith.constant 0 : i32
    return %arg0, %c0_i32, %c0_i32_0 : i32, i32, i32
  }
  func.func @transform_4(%arg0: i32) -> (i32, i32, i32) {
    %c0_i32 = arith.constant 0 : i32
    %c0_i32_0 = arith.constant 0 : i32
    %c0_i32_1 = arith.constant 0 : i32
    return %arg0, %c0_i32, %c0_i32_0 : i32, i32, i32
  }
  func.func @transform_5(%arg0: i32) -> (i32, i32, i32) {
    %c0_i32 = arith.constant 0 : i32
    %c0_i32_0 = arith.constant 0 : i32
    %c0_i32_1 = arith.constant 0 : i32
    return %arg0, %c0_i32, %c0_i32_0 : i32, i32, i32
  }
}

</mosaic_0001>

<bundles_post_ra>
// kernel: mistral_flash_attention2_forward.1
= control target key start
LH: loop header
LB: loop body
LE: loop exit
PB: predicated region body
PF: predicated region fallthrough
CT: control target
= control target key end

     0   :  { %10 = vsyncpa [#allocation3], 0  ;;  %s1972_s0 = inlined_call_operand.vmem [shape: f32[2,8,32], index: 0, kind: input, shape index: {}]   ;;  %s1973_s1 = inlined_call_operand.vmem [shape: f32[64,32], index: 1, kind: input, shape index: {}]   ;;  %s1974_s2 = inlined_call_operand.vmem [shape: f32[32,32], index: 2, kind: input, shape index: {}]   ;;  %s1975_s3 = inlined_call_operand.vmem [shape: f32[2,8,8], index: 3, kind: input, shape index: {}]   ;;  %s1976_s4 = inlined_call_operand.vmem [shape: f32[2,8,8], index: 4, kind: input, shape index: {}]   ;;  %s1977_s5 = inlined_call_operand.hbm [shape: f32[2,8,32], index: 5, kind: output, shape index: {}]  }
   0x1   :  { %12 = vsyncpa [#allocation3 + $0x1], 0  ;;  %s1659_s18 = smov 0   ;;  %s1661_s19 = smov 0  }
   0x2   :  { %s1663_s20 = smov 0   ;;  %s1665_s21 = smov 0  }
   0x3 LB: > { %s1680_s22 = sadd.s32 4294967295, %s1605_s21   ;;  %s1331_s23 = sadd.s32 4294967294, %s1605_s21   ;;  %s1605_s21 = sphi %s1665_s21, %s1983_s21   ;;  %s1601_s20 = sphi %s1663_s20, %s1982_s20   ;;  %s1597_s19 = sphi %s1661_s19, %s1981_s19   ;;  %s1593_s18 = sphi %s1659_s18, %s1980_s18  }
   0x4   : > { %s1684_s24 = sadd.s32 1, %s1605_s21   ;;  %s145_s25 = sadd.s32 1, %s1601_s20 }
   0x5   : > { %s142_s26 = ssub.s32 %s1605_s21, %s1684_s24  ;;  %p155_p0 = scmp.ne.s32.totalorder %s1601_s20, %s1597_s19 }
   0x6   : > { %p143_p1 = scmp.eq.s32.totalorder %s142_s26, 0  ;;  %p156_p2 = scmp.eq.s32.totalorder %s1680_s22, 1 }
   0x7   : > { %p161_p3 = scmp.ne.s32.totalorder %s1597_s19, %s1593_s18  ;;  %p162_p4 = scmp.eq.s32.totalorder %s1331_s23, 1 }
   0x8   : > { %s1695_s27 = scalar_select %p143_p1, %s1601_s20, %s145_s25  }
   0x9   : > { %p1697_p5 = por %p156_p2, %p155_p0  ;;  %p1701_p6 = por %p162_p4, %p161_p3 }
   0xa   : > { %p1334_p7 = scmp.ge.s32.totalorder %s1605_s21, 1  ;;  %p207_p8 = scmp.lt.s32.totalorder %s1605_s21, 3 }
   0xc   : > { %p208_p9 = pnand %p1334_p7, %p207_p8 }
   0xd   : > { %p242_p10 = scmp.lt.s32.totalorder (!%p208_p9), %s1680_s22, 1  ;;  %s1609_s16 = smov (!%p208_p9), 32  }
   0xe   : > { %211 = sbr.rel (%p208_p9) target bundleno = 2538 (0x9ea), region = 40  ;;  %s1610_s15 = smov (!%p208_p9), 92  }
   0xf   : > { %s1611_s17 = smov (!%p208_p9), 100   ;;  %s1612_s23 = smov (!%p208_p9), 124  }
  0x10   : > { %s1613_s6 = smov (!%p208_p9), 4   ;;  %s1614_s7 = smov (!%p208_p9), 116  }
  0x11   : > { %s1615_s8 = smov (!%p208_p9), 8   ;;  %s1619_s11 = smov (!%p208_p9), 84  }
  0x12   : > { %s1620_s12 = smov (!%p208_p9), 108   ;;  %s1625_s25 = smov (!%p208_p9), 24  }
  0x13   : > { %v262_v0 = vld [vmem:[%s1973_s1 + $0x38] sm:$0xff]  ;;  %vm269_vm0 = vcmask 261120   ;;  %v1607_v1 = vmov 0.0   ;;  %vm1608_vm1 = vmmov 0   ;;  %v261_v2 = vld [vmem:[%s1973_s1 + $0x30] sm:$0xff]  ;;  %s243_s9 = scalar_select %p242_p10, %s1680_s22, 1  ;;  %v367_v41 = vlaneseq }
  0x14   : > { %1399 = vmatprep.subr.mxu0 %v1607_v1  ;;  %1415 = vmatprep.mubr.msk.f32.mxu0 %vm1608_vm1, %v1607_v1  ;;  %v260_v3 = vld [vmem:[%s1973_s1 + $0x28] sm:$0xff]  ;;  %v259_v5 = vld [vmem:[%s1973_s1 + $0x20] sm:$0xff]  ;;  %v258_v6 = vld [vmem:[%s1973_s1 + $0x18] sm:$0xff]  ;;  %vm386_vm2 = vcmask 31744   ;;  %vm425_vm3 = vcmask 64512   ;;  %s1627_s26 = smov 104  }
  0x15   : > { %1400 = vmatpush3.xpose.msk.msra.mxu0 %vm269_vm0, %v262_v0  ;;  %1418 = vmatprep.subr.mxu1 %v1607_v1  ;;  %s1723_s10 = sshll.u32 %s243_s9, 3  ;;  %v257_v7 = vld [vmem:[%s1973_s1 + $0x10] sm:$0xff]  ;;  %v256_v8 = vld [vmem:[%s1973_s1 + $0x8] sm:$0xff]  ;;  %v255_v9 = vld [vmem:[%s1973_s1] sm:$0xff]  ;;  %s1618_s9 = smov 120   ;;  %v1823_v42 = vshrl.u32 %v367_v41, 7 }
  0x16   : > { %1401 = vmatprep.subr.mxu0 %v1607_v1  ;;  %1420 = vmatprep.mubr.msk.f32.mxu1 %vm1608_vm1, %v1607_v1  ;;  %s249_s13 = scalar_lea.vmem %s1975_s3, %s1723_s10  ;;  %s245_s14 = scalar_lea.vmem %s1972_s0, %s1723_s10  ;;  %v1825_v43 = vand.u32 127, %v367_v41  ;;  %vm1144_vm5 = vcmask 130048   ;;  %vm1146_vm6 = vcmask 195584  }
  0x17   : > { %v1734_v4 = vld [vmem:[%s249_s13] sm:$0xff]  ;;  %s253_s30 = scalar_lea.vmem %s1976_s4, %s1723_s10  ;;  %s1616_s10 = smov 96  }
  0x18   : > { %373 = vrot.lane.b32.xlu1 %v1734_v4, %s1609_s16  ;;  %v254_v10 = vld [vmem:[%s245_s14] sm:$0xff]  ;;  %s1621_s13 = smov 40   ;;  %s1622_s14 = smov 16   ;;  %vm371_vm4 = vcmp.le.s32.totalorder %v1825_v43, %v1823_v42 }
  0x19   : > { %1402 = vmatpush3.xpose.msk.msra.mxu0 %vm269_vm0, %v261_v2  ;;  %v1786_v15 = vld [vmem:[%s253_s30] sm:$0xff] }
  0x1a   : > { %1403 = vmatprep.subr.mxu0 %v1607_v1 }
  0x1d   : > { %1404 = vmatpush3.xpose.msk.msra.mxu0 %vm269_vm0, %v260_v3 }
  0x1e   : > { %1405 = vmatprep.subr.mxu0 %v1607_v1 }
  0x21   : > { %1406 = vmatpush3.xpose.msk.msra.mxu0 %vm269_vm0, %v259_v5 }
  0x22   : > { %1407 = vmatprep.subr.mxu0 %v1607_v1 }
  0x25   : > { %1408 = vmatpush3.xpose.msk.msra.mxu0 %vm269_vm0, %v258_v6 }
  0x26   : > { %1409 = vmatprep.subr.mxu0 %v1607_v1 }
  0x29   : > { %1410 = vmatpush3.xpose.msk.msra.mxu0 %vm269_vm0, %v257_v7 }
  0x2a   : > { %1411 = vmatprep.subr.mxu0 %v1607_v1 }
  0x2d   : > { %1412 = vmatpush3.xpose.msk.msra.mxu0 %vm269_vm0, %v256_v8 }
  0x2e   : > { %1413 = vmatprep.subr.mxu0 %v1607_v1 }
  0x31   : > { %1414 = vmatpush3.xpose.msk.msra.mxu0 %vm269_vm0, %v255_v9 }
  0x32   : > { %1458 = vmatprep.subr.mxu0 %v1607_v1 }
  0x34   : > { %1416 = vmatmul.mubr.msk.f32.vlgmr.msra.gmra.mxu0 %vm269_vm0, %v254_v10 }
  0x35   : > { %1466 = vmatprep.mubr.msk.f32.mxu0 %vm1608_vm1, %v1607_v1 }
  0x8a   : > { %v374_v19 = vpop.permute.xlu1 %373 }
  0xf4   : > { %v1772_v11 = vpop.f32.mrf.mxu0 }
  0xf5   : > { %v1775_v12 = vsub.f32 0.0, %v1772_v11  ;;  %v376_v20 = vmul.f32 %v374_v19, %v1772_v11  ;;  %v411_v27 = vmul.f32 %v1772_v11, %v1734_v4 }
  0xf6   : > { %v1417_v13 = vpop.f32.mrf.mxu0 }
  0xf7   : > { %379 = vrot.lane.b32.xlu0 %v1775_v12, %s1610_s15 }
  0xfb   : > { %383 = vrot.lane.b32.xlu0 %v1772_v11, %s1611_s17 }
  0xff   : > { %412 = vrot.lane.b32.xlu0 %v1775_v12, %s1612_s23 }
 0x169   : > { %v380_v14 = vpop.permute.xlu0 %379 }
 0x16d   : > { %v384_v16 = vpop.permute.xlu0 %383 }
 0x16e   : > { %v387_v17 = vsel %vm386_vm2, %v380_v14, %v384_v16 }
 0x16f   : > { %v388_v18 = vmul.f32 %v387_v17, %v1786_v15 }
 0x171   : > { %390 = vrot.lane.b32.xlu1 %v388_v18, %s1609_s16  ;;  %v413_v24 = vpop.permute.xlu0 %412  ;;  %s1617_s16 = smov 80  }
 0x175   : > { %415 = vrot.lane.b32.xlu1 %v1772_v11, %s1613_s6 }
 0x179   : > { %593 = vrot.lane.b32.xlu1 %v1775_v12, %s1614_s7 }
 0x17d   : > { %589 = vrot.lane.b32.xlu1 %v1734_v4, %s1615_s8 }
 0x1e3   : > { %v391_v21 = vpop.permute.xlu1 %390 }
 0x1e4   : > { %v393_v22 = vadd.f32 %v391_v21, %v376_v20 }
 0x1e6   : > { %423 = vrot.lane.b32.xlu0 %v393_v22, %s1616_s10 }
 0x1e7   : > { %v416_v23 = vpop.permute.xlu1 %415 }
 0x1e8   : > { %v418_v25 = vsel %vm386_vm2, %v413_v24, %v416_v23 }
 0x1e9   : > { %v419_v26 = vmul.f32 %v418_v25, %v1786_v15 }
 0x1ea   : > { %596 = vrot.lane.b32.xlu0 %v1772_v11, %s1612_s23  ;;  %s1624_s23 = smov 112  }
 0x1eb   : > { %v420_v28 = vadd.f32 %v419_v26, %v411_v27  ;;  %v594_v31 = vpop.permute.xlu1 %593 }
 0x1ed   : > { %v421_v30 = vmul.f32 0.35355338, %v420_v28 }
 0x1ef   : > { %v590_v35 = vpop.permute.xlu1 %589 }
 0x1f0   : > { %v592_v36 = vmul.f32 %v590_v35, %v1772_v11 }
 0x258   : > { %v424_v29 = vpop.permute.xlu0 %423 }
 0x259   : > { %1419 = vmatpush3.xpose.msk.msra.mxu1 %vm425_vm3, %v424_v29 }
 0x25a   : > { %1423 = vmatprep.subr.mxu1 %v1607_v1 }
 0x25c   : > { %1421 = vmatmul.mubr.msk.f32.vlgmr.msra.gmra.mxu1 %vm425_vm3, %v421_v30  ;;  %v597_v32 = vpop.permute.xlu0 %596 }
 0x25d   : > { %v599_v33 = vsel %vm386_vm2, %v594_v31, %v597_v32  ;;  %1425 = vmatprep.mubr.msk.f32.mxu1 %vm1608_vm1, %v1607_v1 }
 0x25e   : > { %v600_v34 = vmul.f32 %v599_v33, %v1786_v15 }
 0x260   : > { %602 = vrot.lane.b32.xlu0 %v600_v34, %s1615_s8 }
 0x264   : > { %511 = vrot.lane.b32.xlu0 %v1772_v11, %s1617_s16 }
 0x2d2   : > { %v603_v37 = vpop.permute.xlu0 %602 }
 0x2d3   : > { %v605_v38 = vadd.f32 %v603_v37, %v592_v36 }
 0x2d5   : > { %v606_v39 = vmul.f32 0.35355338, %v605_v38 }
 0x2d6   : > { %v512_v40 = vpop.permute.xlu0 %511 }
 0x2d7   : > { %608 = vrot.lane.b32.xlu0 %v606_v39, %s1618_s9  ;;  %1424 = vmatpush3.msra.mxu1 %v512_v40 }
 0x2d8   : > { %1428 = vmatprep.subr.mxu1 %v1607_v1 }
 0x2db   : > { %398 = vrot.lane.b32.xlu0 %v1775_v12, %s1619_s11 }
 0x2df   : > { %401 = vrot.lane.b32.xlu0 %v1772_v11, %s1610_s15  ;;  %s1623_s15 = smov 88  }
 0x2e3   : > { %771 = vrot.lane.b32.xlu0 %v1775_v12, %s1620_s12 }
 0x2e7   : > { %774 = vrot.lane.b32.xlu0 %v1772_v11, %s1614_s7 }
 0x2eb   : > { %394 = vrot.lane.b32.xlu0 %v1734_v4, %s1621_s13 }
 0x2ef   : > { %767 = vrot.lane.b32.xlu0 %v1734_v4, %s1622_s14 }
 0x31c   : > { %v497_v44 = vpop.f32.mrf.mxu1 }
 0x31d   : > { %v501_v45 = vsel %vm371_vm4, %v497_v44, -1.7014117e+38 }
 0x31e   : > { %v1422_v46 = vpop.f32.mrf.mxu1  ;;  %v502_v47 = vsel %vm425_vm3, %v501_v45, -inf }
 0x31f   : > { %503 = vmax.xlane.f32.xlu1 %v502_v47 }
 0x349   : > { %v609_v48 = vpop.permute.xlu0 %608 }
 0x34d   : > { %v399_v49 = vpop.permute.xlu0 %398 }
 0x351   : > { %v402_v50 = vpop.permute.xlu0 %401 }
 0x352   : > { %v404_v51 = vsel %vm386_vm2, %v399_v49, %v402_v50 }
 0x353   : > { %v405_v52 = vmul.f32 %v404_v51, %v1786_v15 }
 0x355   : > { %407 = vrot.lane.b32.xlu0 %v405_v52, %s1621_s13  ;;  %v772_v53 = vpop.permute.xlu0 %771 }
 0x359   : > { %v775_v54 = vpop.permute.xlu0 %774 }
 0x35a   : > { %v777_v55 = vsel %vm386_vm2, %v772_v53, %v775_v54 }
 0x35b   : > { %v778_v56 = vmul.f32 %v777_v55, %v1786_v15 }
 0x35d   : > { %780 = vrot.lane.b32.xlu1 %v778_v56, %s1622_s14  ;;  %v395_v61 = vpop.permute.xlu0 %394 }
 0x35e   : > { %v397_v63 = vmul.f32 %v395_v61, %v1772_v11  ;;  %v266_v61 = vld [vmem:[%s1974_s2 + $0x18] sm:$0xff] }
 0x35f   : > { %1459 = vmatpush3.xpose.msk.msra.mxu0 %vm269_vm0, %v266_v61 }
 0x360   : > { %1460 = vmatprep.subr.mxu0 %v1607_v1 }
 0x361   : > { %v768_v62 = vpop.permute.xlu0 %767 }
 0x362   : > { %v770_v3 = vmul.f32 %v768_v62, %v1772_v11  ;;  %v265_v62 = vld [vmem:[%s1974_s2 + $0x10] sm:$0xff] }
 0x363   : > { %1461 = vmatpush3.xpose.msk.msra.mxu0 %vm269_vm0, %v265_v62 }
 0x364   : > { %1462 = vmatprep.subr.mxu0 %v1607_v1 }
 0x3a8   : > { %v504_v57 = vpop.xlane.xlu1 %503 }
 0x3a9   : > { %v505_v58 = vsub.f32 %v501_v45, %v504_v57 }
 0x3ab   : > { %v506_v59 = vmul.f32 1.442695, %v505_v58 }
 0x3ad   : > { %1529 = vpow2.f32 %v506_v59 }
 0x3ba   : > { %v1838_v60 = vpop.eup %1529 }
 0x3bb   : > { %1426 = vmatmul.mubr.msk.f32.vlgmr.msra.gmra.mxu1 %vm425_vm3, %v1838_v60  ;;  %v508_v43 = vsel %vm425_vm3, %v1838_v60, 0.0  ;;  %v264_v60 = vld [vmem:[%s1974_s2 + $0x8] sm:$0xff] }
 0x3bc   : > { %1429 = vmatpush3.xpose.msk.msra.mxu1 %vm425_vm3, %v424_v29  ;;  %1430 = vmatprep.mubr.msk.f32.mxu1 %vm1608_vm1, %v1607_v1 }
 0x3bd   : > { %1433 = vmatprep.subr.mxu1 %v1607_v1  ;;  %1463 = vmatpush3.xpose.msk.msra.mxu0 %vm269_vm0, %v264_v60 }
 0x3be   : > { %1464 = vmatprep.subr.mxu0 %v1607_v1 }
 0x3bf   : > { %1431 = vmatmul.mubr.msk.f32.vlgmr.msra.gmra.mxu1 %vm425_vm3, %v609_v48 }
 0x3c0   : > { %1434 = vmatpush3.msra.mxu1 %v512_v40  ;;  %1435 = vmatprep.mubr.msk.f32.mxu1 %vm1608_vm1, %v1607_v1 }
 0x3c1   : > { %1438 = vmatprep.subr.mxu1 %v1607_v1 }
 0x3c7   : > { %v408_v0 = vpop.permute.xlu0 %407 }
 0x3c8   : > { %v410_v2 = vadd.f32 %v408_v0, %v397_v63  ;;  %v263_v63 = vld [vmem:[%s1974_s2] sm:$0xff] }
 0x3c9   : > { %1465 = vmatpush3.xpose.msk.msra.mxu0 %vm269_vm0, %v263_v63 }
 0x3ca   : > { %789 = vrot.lane.b32.xlu1 %v410_v2, %s1623_s15 }
 0x3cf   : > { %v781_v5 = vpop.permute.xlu1 %780 }
 0x3d0   : > { %v783_v6 = vadd.f32 %v781_v5, %v770_v3 }
 0x3d2   : > { %v784_v7 = vmul.f32 0.35355338, %v783_v6 }
 0x3d4   : > { %786 = vrot.lane.b32.xlu1 %v784_v7, %s1624_s23 }
 0x3d8   : > { %957 = vrot.lane.b32.xlu1 %v1775_v12, %s1611_s17  ;;  %s1626_s17 = smov 72  }
 0x3dc   : > { %960 = vrot.lane.b32.xlu1 %v1772_v11, %s1620_s12  ;;  %s239_s12 = sand.u32 1, %s1597_s19  }
 0x3dd   : > { %s1335_s13 = sshll.u32 %s239_s12, 3  ;;  %s1235_s30 = scalar_lea.sflag [#allocation3], %s239_s12 }
 0x3de   : > { %s241_s15 = scalar_lea.vmem [#allocation2], %s1335_s13 }
 0x3df   : > { %s1248_s23 = sshll.u32 %s241_s15, 4  ;;  %s1932_s23 = int_to_ptr.vmem [resolvable:$true] %s1248_s23 }
 0x3e0   : > { %953 = vrot.lane.b32.xlu1 %v1734_v4, %s1625_s25  ;;  %s1545_s6 = scalar_lea.vmem %s1932_s23, 128 }
 0x3e1   : > { %p1546_p11 = scmp.ne.s32.totalorder %s1932_s23, %s1545_s6 }
 0x3e3   : > { %p1547_p12 = pnand %p1546_p11, %p1697_p5 }
 0x3e5   : > { %p1548_p13 = pneg %p1547_p12 }
 0x43c   : > { %v790_v13 = vpop.permute.xlu1 %789 }
 0x446   : > { %v787_v12 = vpop.permute.xlu1 %786 }
 0x44a   : > { %v958_v18 = vpop.permute.xlu1 %957 }
 0x44e   : > { %v961_v19 = vpop.permute.xlu1 %960 }
 0x44f   : > { %v963_v20 = vsel %vm386_vm2, %v958_v18, %v961_v19 }
 0x450   : > { %v964_v4 = vmul.f32 %v963_v20, %v1786_v15 }
 0x452   : > { %v954_v21 = vpop.permute.xlu1 %953 }
 0x453   : > { %v956_v24 = vmul.f32 %v954_v21, %v1772_v11 }
 0x47b   : > { %v1858_v8 = vpop.f32.mrf.mxu1 }
 0x47d   : > { %v1427_v9 = vpop.f32.mrf.mxu1 }
 0x47f   : > { %v678_v10 = vpop.f32.mrf.mxu1 }
 0x480   : > { %v682_v14 = vsel %vm371_vm4, %v678_v10, -1.7014117e+38 }
 0x481   : > { %v1432_v16 = vpop.f32.mrf.mxu1  ;;  %v683_v17 = vsel %vm425_vm3, %v682_v14, -inf }
 0x482   : > { %684 = vmax.xlane.f32.xlu0 %v683_v17 }
 0x498   : > { %966 = vrot.lane.b32.xlu0 %v964_v4, %s1625_s25 }
 0x49c   : > { %875 = vrot.lane.b32.xlu0 %v1772_v11, %s1626_s17 }
 0x50b   : > { %v685_v22 = vpop.xlane.xlu0 %684 }
 0x50c   : > { %v686_v23 = vsub.f32 %v682_v14, %v685_v22 }
 0x50e   : > { %v687_v25 = vmul.f32 1.442695, %v686_v23 }
 0x50f   : > { %v967_v26 = vpop.permute.xlu0 %966 }
 0x510   : > { %1531 = vpow2.f32 %v687_v25  ;;  %v969_v27 = vadd.f32 %v967_v26, %v956_v24 }
 0x512   : > { %v970_v28 = vmul.f32 0.35355338, %v969_v27 }
 0x513   : > { %v876_v15 = vpop.permute.xlu0 %875 }
 0x514   : > { %972 = vrot.lane.b32.xlu0 %v970_v28, %s1627_s26 }
 0x51d   : > { %v1532_v29 = vpop.eup %1531 }
 0x51e   : > { %1436 = vmatmul.mubr.msk.f32.vlgmr.msra.gmra.mxu1 %vm425_vm3, %v1532_v29  ;;  %v689_v35 = vsel %vm425_vm3, %v1532_v29, 0.0 }
 0x51f   : > { %1439 = vmatpush3.xpose.msk.msra.mxu1 %vm425_vm3, %v790_v13  ;;  %1440 = vmatprep.mubr.msk.f32.mxu1 %vm1608_vm1, %v1607_v1 }
 0x520   : > { %1443 = vmatprep.subr.mxu1 %v1607_v1 }
 0x522   : > { %1441 = vmatmul.mubr.msk.f32.vlgmr.msra.gmra.mxu1 %vm425_vm3, %v787_v12 }
 0x523   : > { %1444 = vmatpush3.msra.mxu1 %v876_v15  ;;  %1445 = vmatprep.mubr.msk.f32.mxu1 %vm1608_vm1, %v1607_v1 }
 0x524   : > { %1448 = vmatprep.subr.mxu1 %v1607_v1 }
 0x586   : > { %v973_v41 = vpop.permute.xlu0 %972 }
 0x5de   : > { %v761_v11 = vpop.f32.mrf.mxu1 }
 0x5e0   : > { %v1437_v30 = vpop.f32.mrf.mxu1 }
 0x5e2   : > { %v861_v31 = vpop.f32.mrf.mxu1 }
 0x5e3   : > { %v865_v32 = vsel %vm371_vm4, %v861_v31, -1.7014117e+38 }
 0x5e4   : > { %v1442_v33 = vpop.f32.mrf.mxu1  ;;  %v866_v34 = vsel %vm425_vm3, %v865_v32, -inf }
 0x5e5   : > { %867 = vmax.xlane.f32.xlu1 %v866_v34 }
 0x5e9   : > { %690 = vadd.xlane.f32.xlu1 %v689_v35 }
 0x66e   : > { %v868_v36 = vpop.xlane.xlu1 %867 }
 0x66f   : > { %v869_v37 = vsub.f32 %v865_v32, %v868_v36 }
 0x671   : > { %v870_v38 = vmul.f32 1.442695, %v869_v37 }
 0x672   : > { %v691_v48 = vpop.xlane.xlu1 %690 }
 0x673   : > { %1533 = vpow2.f32 %v870_v38 }
 0x680   : > { %v1534_v39 = vpop.eup %1533 }
 0x681   : > { %1446 = vmatmul.mubr.msk.f32.vlgmr.msra.gmra.mxu1 %vm425_vm3, %v1534_v39  ;;  %v872_v40 = vsel %vm425_vm3, %v1534_v39, 0.0 }
 0x682   : > { %1449 = vmatpush3.xpose.msk.msra.mxu1 %vm425_vm3, %v790_v13  ;;  %873 = vadd.xlane.f32.xlu1 %v872_v40 }
 0x683   : > { %1450 = vmatprep.mubr.msk.f32.mxu1 %vm1608_vm1, %v1607_v1  ;;  %1453 = vmatprep.subr.mxu1 %v1607_v1 }
 0x685   : > { %1451 = vmatmul.mubr.msk.f32.vlgmr.msra.gmra.mxu1 %vm425_vm3, %v973_v41 }
 0x686   : > { %1454 = vmatpush3.msra.mxu1 %v876_v15  ;;  %1455 = vmatprep.mubr.msk.f32.mxu1 %vm1608_vm1, %v1607_v1 }
 0x70b   : > { %v874_v51 = vpop.xlane.xlu1 %873 }
 0x70c   : > { %1535 = vrcp.f32 %v874_v51 }
 0x719   : > { %v1536_v52 = vpop.eup %1535 }
 0x741   : > { %v947_v44 = vpop.f32.mrf.mxu1 }
 0x742   : > { %v952_v53 = vmul.f32 %v1536_v52, %v947_v44 }
 0x743   : > { %v1447_v45 = vpop.f32.mrf.mxu1 }
 0x745   : > { %v1042_v46 = vpop.f32.mrf.mxu1 }
 0x746   : > { %v1046_v47 = vsel %vm371_vm4, %v1042_v46, -1.7014117e+38 }
 0x747   : > { %v1452_v49 = vpop.f32.mrf.mxu1  ;;  %v1047_v50 = vsel %vm425_vm3, %v1046_v47, -inf }
 0x748   : > { %1048 = vmax.xlane.f32.xlu0 %v1047_v50 }
 0x75e   : > { %1136 = vrot.lane.b32.xlu0 %v952_v53, %s1622_s14  ;;  %s1366_s14 = sshll.u32 %s1680_s22, 7  ;;  %s1628_s22 = smov [#allocation2]  }
 0x75f   : > { %s1930_s26 = scalar_lea.hbm %s1977_s5, %s1366_s14  ;;  %s1549_s7 = sshll.u32 %s1628_s22, 4  ;;  %s1550_s7 = int_to_ptr.vmem [resolvable:$false] %s1549_s7 }
 0x760   : > { %s1551_s10 = scalar_lea.vmem %s1550_s7, 256  ;;  %p1552_p0 = scmp.lt.s32.totalorder %s1932_s23, %s1550_s7 }
 0x761   : > { %p1553_p1 = scmp.lt.s32.totalorder %s1551_s10, %s1545_s6 }
 0x763   : > { %p1554_p2 = por %p1553_p1, %p1552_p0 }
 0x765   : > { %p1555_p3 = pnand %p1554_p2, %p1548_p13 }
 0x7d1   : > { %v1049_v54 = vpop.xlane.xlu0 %1048 }
 0x7d2   : > { %v1050_v55 = vsub.f32 %v1046_v47, %v1049_v54 }
 0x7d4   : > { %v1051_v56 = vmul.f32 1.442695, %v1050_v55 }
 0x7d5   : > { %v1137_v14 = vpop.permute.xlu0 %1136 }
 0x7d6   : > { %1537 = vpow2.f32 %v1051_v56 }
 0x7d7   : > { %1539 = vrcp.f32 %v691_v48 }
 0x7e3   : > { %v1538_v57 = vpop.eup %1537 }
 0x7e4   : > { %1456 = vmatmul.mubr.msk.f32.vlgmr.msra.gmra.mxu1 %vm425_vm3, %v1538_v57  ;;  %v1053_v42 = vsel %vm425_vm3, %v1538_v57, 0.0  ;;  %v1540_v58 = vpop.eup %1539 }
 0x7e5   : > { %1054 = vadd.xlane.f32.xlu1 %v1053_v42  ;;  %v766_v59 = vmul.f32 %v1540_v58, %v761_v11 }
 0x7e9   : > { %509 = vadd.xlane.f32.xlu1 %v508_v43 }
 0x7fa   : > { %1132 = vrot.lane.b32.xlu1 %v766_v59, %s1615_s8 }
 0x86e   : > { %v1055_v0 = vpop.xlane.xlu1 %1054 }
 0x86f   : > { %1541 = vrcp.f32 %v1055_v0 }
 0x872   : > { %v510_v7 = vpop.xlane.xlu1 %509 }
 0x873   : > { %1543 = vrcp.f32 %v510_v7 }
 0x876   : > { %v1133_v10 = vpop.permute.xlu1 %1132 }
 0x87c   : > { %v1542_v2 = vpop.eup %1541 }
 0x880   : > { %v1544_v9 = vpop.eup %1543 }
 0x881   : > { %v588_v1 = vmul.f32 %v1544_v9, %v1858_v8 }
 0x883   : > { %v1143_v13 = vsel %vm425_vm3, %v588_v1, %v1133_v10 }
 0x884   : > { %v1145_v16 = vsel %vm1144_vm5, %v1143_v13, %v1137_v14 }
 0x8a4   : > { %v1125_v3 = vpop.f32.mrf.mxu1 }
 0x8a5   : > { %v1130_v5 = vmul.f32 %v1542_v2, %v1125_v3 }
 0x8a6   : > { %v1457_v6 = vpop.f32.mrf.mxu1 }
 0x8a7   : > { %1140 = vrot.lane.b32.xlu1 %v1130_v5, %s1625_s25 }
 0x919   : > { %v1141_v17 = vpop.permute.xlu1 %1140 }
 0x91a   : > { %v1147_v12 = vsel %vm1146_vm6, %v1145_v16, %v1141_v17 }
 0x91b   : > { %1467 = vmatmul.mubr.msk.f32.vlgmr.msra.gmra.mxu0 %vm269_vm0, %v1147_v12 }
 0x9db   : > { %v1229_v8 = vpop.f32.mrf.mxu0 }
 0x9dc   : > { %1233 = vst.msk [vmem:[%s241_s15] sm:$0xff] %vm269_vm0, %v1229_v8 }
 0x9dd   : > { %v1468_v18 = vpop.f32.mrf.mxu0 }
 0x9de   : > { %1558 = shalt.err (!%p1555_p3)
}
 0x9df   : > { %s1559_s16 = scalar_lea.hbm %s1930_s26, 128  ;;  %s1563_s11 = scalar_lea.hbm %s1977_s5, 256 }
 0x9e0   : > { %p1560_p4 = scmp.ne.s32.totalorder %s1930_s26, %s1559_s16  ;;  %p1564_p9 = scmp.lt.s32.totalorder %s1930_s26, %s1977_s5 }
 0x9e1   : > { %p1565_p10 = scmp.lt.s32.totalorder %s1563_s11, %s1559_s16 }
 0x9e2   : > { %p1561_p7 = pnand %p1560_p4, %p1697_p5 }
 0x9e3   : > { %p1566_p11 = por %p1565_p10, %p1564_p9 }
 0x9e4   : > { %p1562_p8 = pneg %p1561_p7 }
 0x9e6   : > { %p1567_p12 = pnand %p1566_p11, %p1562_p8 }
 0x9e8   : > { %1570 = shalt.err (!%p1567_p12)
}
 0x9e9   : > { %1469 = dma.vmem_to_hbm [thread:$0]  (%p1697_p5), %s1932_s23, 128, %s1930_s26, %s1235_s30  }
 0x9ea PF: > { %p1475_p13 = scmp.ge.s32.totalorder %s1605_s21, 2  ;;  %s1260_s14 = sand.u32 1, %s1593_s18  }
 0x9eb   : > { %s1261_s15 = scalar_lea.sflag [#allocation3], %s1260_s14 }
 0x9ec   : > { %p1472_p0 = pnand %p1475_p13, %p1701_p6 }
 0x9ee   : > { %p1473_p1 = pneg %p1472_p0 }
 0x9f0   : > { %1588 = dma.done.wait (%p1473_p1), %s1261_s15, 128  }
 0x9f1   : > { %1590 = vsyncadd (%p1473_p1), %s1261_s15, 4294967168  ;;  %p15_p2 = scmp.ge.s32.totalorder %s1684_s24, 4   ;;  %s1980_s18 = smov %s1597_s19 }
 0x9f2   : > { %s1981_s19 = smov %s1601_s20  ;;  %s1982_s20 = smov %s1695_s27 }
 0x9f3   : > { %s1983_s21 = smov %s1684_s24  ;;  %17 = sbr.rel (!%p15_p2) target bundleno = 3 (0x3), region = 81 }
 0x9f8   :  { %1266 = vsyncpa [#allocation3], 1 }
 0x9f9   :  { %1268 = vsyncpa [#allocation3 + $0x1], 1 }

</bundles_post_ra>
